<compile_context>
chip_gen: v7x
topology: tpu7x:2x2x1
jax: 0.10.0
libtpu: 0.0.40
codegen_flags: <defaults>
</compile_context>

<pallas_src>
import numpy as np
import jax
import jax.numpy as jnp
from jax.experimental import pallas as pl
from jax.experimental.pallas import tpu as pltpu

VERTEXNUM = [45, 61, 43, 45, 92, 34, 41, 62, 44, 44,
             58, 42, 40, 60, 41, 35, 64, 28, 50, 62]
NUM_BONES = 20
FEAT = 140                 # per-bone feature size
GLO_IN = 60                # 20 * 3
GLO_HID = 256
GLO_OUT = 100
PROJ_IN = FEAT + GLO_OUT   # 240
PROJ_HID = 256
PROJ_OUT = 100
PROJ_OUT_PAD = 128         # lane-padded per-axis output width
OUT_W = 3 * PROJ_OUT_PAD   # 384, three axis nets stacked along lanes

# Static flat gather index: maps the 991 kept vertices (bone-ordered) to
# positions in the kernel's (num, 3, 128) per-batch output slab.
_BONE_IDX = np.concatenate([np.full(v, i, dtype=np.int32)
                            for i, v in enumerate(VERTEXNUM)])
_VERT_IDX = np.concatenate([np.arange(v, dtype=np.int32) for v in VERTEXNUM])
_GATHER_IDX = (_BONE_IDX[:, None] * OUT_W
               + np.arange(3, dtype=np.int32)[None, :] * PROJ_OUT_PAD
               + _VERT_IDX[:, None])                      # (991, 3)


# ----------------------------- fused kernel -----------------------------
def _hp2m_kernel(x_ref, glo_ref, sel_ref,
                 gw1_ref, gb1_ref, gw2_ref, gb2_ref,
                 wx_ref, wz_ref, beff_ref,
                 out_ref):
    # x_ref   : (NB, 140) bf16   bone features, NB = B*num (row = b*num + bone)
    # glo_ref : (B, 60)   bf16   global joints
    # sel_ref : (NB, B)   f32    one-hot row->batch selector
    # wx_ref  : (140, 384) bf16  folded projection weights (x part, 3 axes on lanes)
    # wz_ref  : (100, 384) bf16  folded projection weights (z part)
    # beff_ref: (1, 384)  f32    folded projection bias
    # out_ref : (NB, 384) f32    lane-dense output slab
    f32 = jnp.float32
    bf16 = jnp.bfloat16

    # GlobalNet (fused): z = ReLU(ReLU(g @ GW1 + gb1) @ GW2 + gb2)      (B, 100)
    h = jnp.dot(glo_ref[...], gw1_ref[...], preferred_element_type=f32) + gb1_ref[...]
    h = jnp.maximum(h, 0.0)
    z = jnp.dot(h.astype(bf16), gw2_ref[...], preferred_element_type=f32) + gb2_ref[...]
    z = jnp.maximum(z, 0.0)

    # Folded projection nets: out = x @ Wx + z @ Wz + b_eff.
    # The z contribution (+ bias) is computed once per batch row and broadcast
    # to all bone rows via a tiny exact f32 one-hot selector matmul.
    zc = jnp.dot(z.astype(bf16), wz_ref[...], preferred_element_type=f32) + beff_ref[...]
    zfull = jnp.dot(sel_ref[...], zc, preferred_element_type=f32)        # (NB, 384)
    out_ref[...] = (jnp.dot(x_ref[...], wx_ref[...], preferred_element_type=f32)
                    + zfull)


# ------------------------ one-time parameter prep ------------------------
def prepare_params(params):
    """Fold the activation-free 3-layer projection nets and cast matmul
    operands to bf16.  Call once; reuse the result for every forward."""
    gw1, gb1, gw2, gb2 = params["global"]
    w1s, b1s, w2s, b2s, w3s, b3s = params["proj"]          # leading axis = x/y/z

    # W_eff = W1 @ W2 @ W3 ; b_eff = b1@W2@W3 + b2@W3 + b3   (exact, done in f32)
    weff = jnp.matmul(jnp.matmul(w1s, w2s), w3s)            # (3, 240, 100)
    beff = (jnp.matmul(jnp.matmul(b1s, w2s), w3s)
            + jnp.matmul(b2s, w3s) + b3s)                   # (3, 1, 100)

    pad = PROJ_OUT_PAD - PROJ_OUT
    weff = jnp.pad(weff, ((0, 0), (0, 0), (0, pad)))        # (3, 240, 128)
    beff = jnp.pad(beff, ((0, 0), (0, 0), (0, pad)))        # (3, 1, 128)

    # Stack the three axis nets along lanes; split K into x part / z part.
    wx = jnp.transpose(weff[:, :FEAT, :], (1, 0, 2)).reshape(FEAT, OUT_W)
    wz = jnp.transpose(weff[:, FEAT:, :], (1, 0, 2)).reshape(GLO_OUT, OUT_W)
    bstk = jnp.transpose(beff, (1, 0, 2)).reshape(1, OUT_W)

    bf16 = jnp.bfloat16
    return (gw1.astype(bf16), gb1.astype(jnp.float32),
            gw2.astype(bf16), gb2.astype(jnp.float32),
            wx.astype(bf16), wz.astype(bf16), bstk.astype(jnp.float32))


def _cost_estimate(B, NB):
    flops = 2 * (B * GLO_IN * GLO_HID
                 + B * GLO_HID * GLO_OUT
                 + B * GLO_OUT * OUT_W
                 + NB * B * OUT_W
                 + NB * FEAT * OUT_W)
    bytes_accessed = (NB * FEAT * 2 + B * GLO_IN * 2 + NB * B * 4
                      + GLO_IN * GLO_HID * 2 + GLO_HID * 4
                      + GLO_HID * GLO_OUT * 2 + GLO_OUT * 4
                      + FEAT * OUT_W * 2 + GLO_OUT * OUT_W * 2 + OUT_W * 4
                      + NB * OUT_W * 4)
    return pl.CostEstimate(flops=flops, transcendentals=0,
                           bytes_accessed=bytes_accessed)


# ------------------------------- wrapper -------------------------------
def hp2mv2_forward(x, gloinfo, original_x, folded):
    B, num, feat = x.shape
    assert num == NUM_BONES and feat == FEAT
    NB = B * num
    gw1, gb1, gw2, gb2, wx, wz, beff = folded

    x_flat = x.reshape(NB, FEAT).astype(jnp.bfloat16)
    glo = gloinfo.astype(jnp.bfloat16)
    # One-hot (NB, B) selector so the per-batch z contribution is broadcast to
    # every bone row inside the kernel (no HBM duplication of z).
    sel = (jnp.arange(NB, dtype=jnp.int32)[:, None] // num
           == jnp.arange(B, dtype=jnp.int32)[None, :]).astype(jnp.float32)

    out = pl.pallas_call(
        _hp2m_kernel,
        out_shape=jax.ShapeDtypeStruct((NB, OUT_W), jnp.float32),
        in_specs=[pl.BlockSpec(memory_space=pltpu.MemorySpace.VMEM)] * 10,
        out_specs=pl.BlockSpec(memory_space=pltpu.MemorySpace.VMEM),
        cost_estimate=_cost_estimate(B, NB),
    )(x_flat, glo, sel, gw1, gb1, gw2, gb2, wx, wz, beff)        # (NB, 384)

    # Glue (wrapper): bone-midpoint add + one flat gather replacing the
    # 20 per-bone slices + concatenate (and dropping the 100->128 lane pad).
    pt = 0.5 * (original_x[..., 0:3] + original_x[..., 3:6])      # (B, num, 3)
    out4 = out.reshape(B, num, 3, PROJ_OUT_PAD) + pt[..., None]
    projects = jnp.take(out4.reshape(B, num * OUT_W),
                        jnp.asarray(_GATHER_IDX), axis=1)         # (B, 991, 3)
    return projects


# --------------------------- pure-JAX reference ---------------------------
def reference_forward(x, gloinfo, original_x, params):
    gw1, gb1, gw2, gb2 = params["global"]
    z = jnp.maximum(gloinfo @ gw1 + gb1, 0.0)
    z = jnp.maximum(z @ gw2 + gb2, 0.0)
    w1s, b1s, w2s, b2s, w3s, b3s = params["proj"]
    B, num, _ = x.shape
    projects = []
    for i in range(num):
        feats = jnp.concatenate([x[:, i, :], z], axis=-1)
        pt = 0.5 * (original_x[:, i, 0:3] + original_x[:, i, 3:6])
        outs = []
        for a in range(3):
            h = feats @ w1s[a] + b1s[a]
            h = h @ w2s[a] + b2s[a]
            h = h @ w3s[a] + b3s[a]
            outs.append(h)
        proj = jnp.stack(outs, axis=-1)                      # (B, 100, 3)
        projects.append(proj[:, :VERTEXNUM[i], :] + pt[:, None, :])
    return jnp.concatenate(projects, axis=1)


if __name__ == "__main__":
    key = jax.random.PRNGKey(0)
    keys = jax.random.split(key, 13)
    B = 2

    x = jax.random.normal(keys[0], (B, NUM_BONES, FEAT), jnp.float32)
    gloinfo = jax.random.normal(keys[1], (B, GLO_IN), jnp.float32)
    original_x = jax.random.normal(keys[2], (B, NUM_BONES, 6), jnp.float32)

    def init(k, shape, scale=0.05):
        return scale * jax.random.normal(k, shape, jnp.float32)

    params = {
        # GlobalNet: Linear(60,256) -> ReLU -> Linear(256,100) -> ReLU
        "global": (init(keys[3], (GLO_IN, GLO_HID)),
                   init(keys[4], (1, GLO_HID)),
                   init(keys[5], (GLO_HID, GLO_OUT)),
                   init(keys[6], (1, GLO_OUT))),
        # ProjectionNet x/y/z stacked along the leading axis:
        # Linear(240,256) -> Linear(256,256) -> Linear(256,100)   (no activations)
        "proj": (init(keys[7], (3, PROJ_IN, PROJ_HID)),
                 init(keys[8], (3, 1, PROJ_HID)),
                 init(keys[9], (3, PROJ_HID, PROJ_HID)),
                 init(keys[10], (3, 1, PROJ_HID)),
                 init(keys[11], (3, PROJ_HID, PROJ_OUT)),
                 init(keys[12], (3, 1, PROJ_OUT))),
    }

    folded = jax.block_until_ready(prepare_params(params))   # one-time fold
    fwd = jax.jit(hp2mv2_forward)
    out = jax.block_until_ready(fwd(x, gloinfo, original_x, folded))

    ref = reference_forward(x, gloinfo, original_x, params)
    assert out.shape == (B, sum(VERTEXNUM), 3), out.shape
    # bf16 MXU inputs (f32 accumulation) -> tolerance relaxed vs. pure-f32 run.
    assert jnp.allclose(out, ref, atol=2e-2, rtol=2e-2), \
        float(jnp.max(jnp.abs(out - ref)))
    print("KERNEL_OK")
</pallas_src>

<mosaic_0001>
module attributes {stable_mosaic.version = 11 : i64} {
  func.func @_hp2m_kernel(%arg0: memref<40x140xbf16, #tpu.memory_space<vmem>>, %arg1: memref<2x60xbf16, #tpu.memory_space<vmem>>, %arg2: memref<40x2xf32, #tpu.memory_space<vmem>>, %arg3: memref<60x256xbf16, #tpu.memory_space<vmem>>, %arg4: memref<1x256xf32, #tpu.memory_space<vmem>>, %arg5: memref<256x100xbf16, #tpu.memory_space<vmem>>, %arg6: memref<1x100xf32, #tpu.memory_space<vmem>>, %arg7: memref<140x384xbf16, #tpu.memory_space<vmem>>, %arg8: memref<100x384xbf16, #tpu.memory_space<vmem>>, %arg9: memref<1x384xf32, #tpu.memory_space<vmem>>, %arg10: memref<40x384xf32, #tpu.memory_space<vmem>>) attributes {dimension_semantics = [], scalar_prefetch = 0 : i64, scratch_operands = 0 : i64, tpu.core_type = #tpu.core_type<tc>} {
    %c0 = arith.constant 0 : index
    %c0_0 = arith.constant 0 : index
    %0 = vector.load %arg1[%c0, %c0_0] : memref<2x60xbf16, #tpu.memory_space<vmem>>, vector<2x60xbf16>
    %c0_1 = arith.constant 0 : index
    %c0_2 = arith.constant 0 : index
    %1 = vector.load %arg3[%c0_1, %c0_2] : memref<60x256xbf16, #tpu.memory_space<vmem>>, vector<60x256xbf16>
    %cst = arith.constant dense<0.000000e+00> : vector<2x256xf32>
    %2 = tpu.matmul %0, %1, %cst {dimension_numbers = #tpu.dot_dimension_numbers<[1], [0], [0], [1], [0, 0, 1, 1], [], []>} : vector<2x60xbf16>, vector<60x256xbf16>, vector<2x256xf32> -> vector<2x256xf32>
    %c0_3 = arith.constant 0 : index
    %c0_4 = arith.constant 0 : index
    %3 = vector.load %arg4[%c0_3, %c0_4] : memref<1x256xf32, #tpu.memory_space<vmem>>, vector<1x256xf32>
    %4 = vector.broadcast %3 : vector<1x256xf32> to vector<2x256xf32>
    %5 = arith.addf %2, %4 : vector<2x256xf32>
    %cst_5 = arith.constant 0.000000e+00 : f32
    %6 = vector.broadcast %cst_5 : f32 to vector<2x256xf32>
    %7 = arith.maximumf %5, %6 : vector<2x256xf32>
    %8 = arith.truncf %7 : vector<2x256xf32> to vector<2x256xbf16>
    %c0_6 = arith.constant 0 : index
    %c0_7 = arith.constant 0 : index
    %9 = vector.load %arg5[%c0_6, %c0_7] : memref<256x100xbf16, #tpu.memory_space<vmem>>, vector<256x100xbf16>
    %cst_8 = arith.constant dense<0.000000e+00> : vector<2x100xf32>
    %10 = tpu.matmul %8, %9, %cst_8 {dimension_numbers = #tpu.dot_dimension_numbers<[1], [0], [0], [1], [0, 0, 1, 1], [], []>} : vector<2x256xbf16>, vector<256x100xbf16>, vector<2x100xf32> -> vector<2x100xf32>
    %c0_9 = arith.constant 0 : index
    %c0_10 = arith.constant 0 : index
    %11 = vector.load %arg6[%c0_9, %c0_10] : memref<1x100xf32, #tpu.memory_space<vmem>>, vector<1x100xf32>
    %12 = vector.broadcast %11 : vector<1x100xf32> to vector<2x100xf32>
    %13 = arith.addf %10, %12 : vector<2x100xf32>
    %cst_11 = arith.constant 0.000000e+00 : f32
    %14 = vector.broadcast %cst_11 : f32 to vector<2x100xf32>
    %15 = arith.maximumf %13, %14 : vector<2x100xf32>
    %16 = arith.truncf %15 : vector<2x100xf32> to vector<2x100xbf16>
    %c0_12 = arith.constant 0 : index
    %c0_13 = arith.constant 0 : index
    %17 = vector.load %arg8[%c0_12, %c0_13] : memref<100x384xbf16, #tpu.memory_space<vmem>>, vector<100x384xbf16>
    %cst_14 = arith.constant dense<0.000000e+00> : vector<2x384xf32>
    %18 = tpu.matmul %16, %17, %cst_14 {dimension_numbers = #tpu.dot_dimension_numbers<[1], [0], [0], [1], [0, 0, 1, 1], [], []>} : vector<2x100xbf16>, vector<100x384xbf16>, vector<2x384xf32> -> vector<2x384xf32>
    %c0_15 = arith.constant 0 : index
    %c0_16 = arith.constant 0 : index
    %19 = vector.load %arg9[%c0_15, %c0_16] : memref<1x384xf32, #tpu.memory_space<vmem>>, vector<1x384xf32>
    %20 = vector.broadcast %19 : vector<1x384xf32> to vector<2x384xf32>
    %21 = arith.addf %18, %20 : vector<2x384xf32>
    %c0_17 = arith.constant 0 : index
    %c0_18 = arith.constant 0 : index
    %22 = vector.load %arg2[%c0_17, %c0_18] : memref<40x2xf32, #tpu.memory_space<vmem>>, vector<40x2xf32>
    %cst_19 = arith.constant dense<0.000000e+00> : vector<40x384xf32>
    %23 = tpu.matmul %22, %21, %cst_19 {dimension_numbers = #tpu.dot_dimension_numbers<[1], [0], [0], [1], [0, 0, 1, 1], [], []>} : vector<40x2xf32>, vector<2x384xf32>, vector<40x384xf32> -> vector<40x384xf32>
    %c0_20 = arith.constant 0 : index
    %c0_21 = arith.constant 0 : index
    %24 = vector.load %arg0[%c0_20, %c0_21] : memref<40x140xbf16, #tpu.memory_space<vmem>>, vector<40x140xbf16>
    %c0_22 = arith.constant 0 : index
    %c0_23 = arith.constant 0 : index
    %25 = vector.load %arg7[%c0_22, %c0_23] : memref<140x384xbf16, #tpu.memory_space<vmem>>, vector<140x384xbf16>
    %cst_24 = arith.constant dense<0.000000e+00> : vector<40x384xf32>
    %26 = tpu.matmul %24, %25, %cst_24 {dimension_numbers = #tpu.dot_dimension_numbers<[1], [0], [0], [1], [0, 0, 1, 1], [], []>} : vector<40x140xbf16>, vector<140x384xbf16>, vector<40x384xf32> -> vector<40x384xf32>
    %27 = arith.addf %26, %23 : vector<40x384xf32>
    %c0_25 = arith.constant 0 : index
    %c0_26 = arith.constant 0 : index
    %28 = vector.load %arg10[%c0_25, %c0_26] : memref<40x384xf32, #tpu.memory_space<vmem>>, vector<40x384xf32>
    tpu.vector_store %arg10[%c0_25, %c0_26], %27 {strides = array<i32>} : memref<40x384xf32, #tpu.memory_space<vmem>>, vector<40x384xf32>,
    return
  }
}

</mosaic_0001>

<bundles_post_ra>
// kernel: hp2mv2_forward.1
= control target key start
LH: loop header
LB: loop body
LE: loop exit
PB: predicated region body
PF: predicated region fallthrough
CT: control target
= control target key end

     0   :  { %15 = vsyncpa [#allocation3], 0  ;;  %s2008_s0 = inlined_call_operand.vmem [shape: bf16[40,140], index: 0, kind: input, shape index: {}]   ;;  %s2009_s1 = inlined_call_operand.vmem [shape: bf16[2,60], index: 1, kind: input, shape index: {}]   ;;  %s2010_s2 = inlined_call_operand.vmem [shape: f32[40,2], index: 2, kind: input, shape index: {}]   ;;  %s2011_s3 = inlined_call_operand.hbm [shape: bf16[60,256], index: 3, kind: input, shape index: {}]   ;;  %s2012_s4 = inlined_call_operand.hbm [shape: f32[1,256], index: 4, kind: input, shape index: {}]   ;;  %s2013_s5 = inlined_call_operand.vmem [shape: bf16[256,100], index: 5, kind: input, shape index: {}]   ;;  %s2014_s6 = inlined_call_operand.hbm [shape: f32[1,100], index: 6, kind: input, shape index: {}]   ;;  %s2015_s7 = inlined_call_operand.hbm [shape: bf16[140,384], index: 7, kind: input, shape index: {}]   ;;  %s2016_s8 = inlined_call_operand.hbm [shape: bf16[100,384], index: 8, kind: input, shape index: {}]   ;;  %s2017_s9 = inlined_call_operand.hbm [shape: f32[1,384], index: 9, kind: input, shape index: {}]   ;;  %s2018_s10 = inlined_call_operand.vmem [shape: f32[40,384], index: 10, kind: output, shape index: {}]  }
   0x1   :  { %16 = vsyncpa [#allocation5], 0 }
   0x2   :  { %17 = vsyncpa [#allocation8], 0 }
   0x3   :  { %18 = vsyncpa [#allocation11], 0  ;;  %s1653_s13 = smov [#allocation4]   ;;  %s1654_s15 = smov [#allocation7]  }
   0x4   :  { %s43_s14 = sshll.u32 %s1653_s13, 4  ;;  %s64_s16 = sshll.u32 %s1654_s15, 4  ;;  %s44_s14 = int_to_ptr.vmem [resolvable:$true] %s43_s14  ;;  %s1721_s16 = int_to_ptr.vmem [resolvable:$true] %s64_s16 }
   0x5   :  { %s1513_s19 = scalar_lea.hbm %s2012_s4, 32 }
   0x6   :  { %p1514_p0 = scmp.ne.s32.totalorder %s2012_s4, %s1513_s19  ;;  %p1517_p1 = scmp.lt.u32.totalorder %s1513_s19, %s2012_s4 }
   0x8   :  { %p1519_p2 = pnand %p1517_p1, %p1514_p0 }
   0xa   :  { %1522 = shalt.err (!%p1519_p2)
}
   0xb   :  { %s1523_s24 = scalar_lea.vmem %s44_s14, 32  ;;  %p1528_p4 = scmp.lt.s32.totalorder %s44_s14, %s44_s14 }
   0xc   :  { %p1524_p3 = scmp.ne.s32.totalorder %s44_s14, %s1523_s24  ;;  %p1529_p5 = scmp.lt.s32.totalorder %s1523_s24, %s1523_s24 }
   0xe   :  { %p1530_p6 = por %p1529_p5, %p1528_p4 }
  0x10   :  { %p1531_p7 = pnand %p1530_p6, %p1524_p3 }
  0x12   :  { %1534 = shalt.err (!%p1531_p7)
}
  0x13   :  { %46 = dma.hbm_to_vmem [thread:$0]  %s2012_s4, 32, %s44_s14, [#allocation5]  }
  0x14   :  { %s1535_s29 = scalar_lea.hbm %s2015_s7, 3456 }
  0x15   :  { %p1536_p8 = scmp.ne.s32.totalorder %s2015_s7, %s1535_s29  ;;  %p1539_p9 = scmp.lt.u32.totalorder %s1535_s29, %s2015_s7 }
  0x17   :  { %p1541_p10 = pnand %p1539_p9, %p1536_p8 }
  0x19   :  { %1544 = shalt.err (!%p1541_p10)
}
  0x1a   :  { %s1545_s15 = scalar_lea.vmem %s1721_s16, 3456  ;;  %p1550_p12 = scmp.lt.s32.totalorder %s1721_s16, %s1721_s16 }
  0x1b   :  { %p1546_p11 = scmp.ne.s32.totalorder %s1721_s16, %s1545_s15  ;;  %p1551_p13 = scmp.lt.s32.totalorder %s1545_s15, %s1545_s15 }
  0x1d   :  { %p1552_p0 = por %p1551_p13, %p1550_p12 }
  0x1f   :  { %p1553_p1 = pnand %p1552_p0, %p1546_p11 }
  0x21   :  { %1556 = shalt.err (!%p1553_p1)
}
  0x22   :  { %s1655_s4 = smov 192   ;;  %s1656_s14 = smov 12  }
  0x23   :  { %70 = dma.hbm_to_vmem [thread:$0]  %s2015_s7, 3456, %s1721_s16, [#allocation8], %s1655_s4, %s1655_s4, %s1656_s14  }
  0x24   :  { %s1657_s19 = smov [#allocation2]   ;;  %s1557_s23 = scalar_lea.hbm %s2011_s3, 1024 }
  0x25   :  { %s30_s20 = sshll.u32 %s1657_s19, 4  ;;  %p1558_p2 = scmp.ne.s32.totalorder %s2011_s3, %s1557_s23  ;;  %s31_s20 = int_to_ptr.vmem [resolvable:$true] %s30_s20 }
  0x26   :  { %p1561_p3 = scmp.lt.u32.totalorder %s1557_s23, %s2011_s3 }
  0x28   :  { %p1563_p4 = pnand %p1561_p3, %p1558_p2 }
  0x2a   :  { %1566 = shalt.err (!%p1563_p4)
}
  0x2b   :  { %s1567_s28 = scalar_lea.vmem %s31_s20, 1024  ;;  %p1572_p6 = scmp.lt.s32.totalorder %s31_s20, %s31_s20 }
  0x2c   :  { %p1568_p5 = scmp.ne.s32.totalorder %s31_s20, %s1567_s28  ;;  %p1573_p7 = scmp.lt.s32.totalorder %s1567_s28, %s1567_s28 }
  0x2e   :  { %p1574_p8 = por %p1573_p7, %p1572_p6 }
  0x30   :  { %p1575_p9 = pnand %p1574_p8, %p1568_p5 }
  0x32   :  { %1578 = shalt.err (!%p1575_p9)
}
  0x33   :  { %s1658_s7 = smov 128   ;;  %s1659_s16 = smov 8  }
  0x34   :  { %36 = dma.hbm_to_vmem [thread:$0]  %s2011_s3, 1024, %s31_s20, [#allocation3], %s1658_s7, %s1658_s7, %s1659_s16  }
  0x35   :  { %s1660_s11 = smov [#allocation6]   ;;  %s1661_s13 = smov [#allocation9]  }
  0x36   :  { %s55_s12 = sshll.u32 %s1660_s11, 4  ;;  %s76_s15 = sshll.u32 %s1661_s13, 4  ;;  %s56_s12 = int_to_ptr.vmem [resolvable:$true] %s55_s12  ;;  %s77_s15 = int_to_ptr.vmem [resolvable:$true] %s76_s15 }
  0x37   :  { %s1579_s19 = scalar_lea.hbm %s2014_s6, 16 }
  0x38   :  { %p1580_p10 = scmp.ne.s32.totalorder %s2014_s6, %s1579_s19  ;;  %p1583_p11 = scmp.lt.u32.totalorder %s1579_s19, %s2014_s6 }
  0x3a   :  { %p1585_p12 = pnand %p1583_p11, %p1580_p10 }
  0x3c   :  { %1588 = shalt.err (!%p1585_p12)
}
  0x3d   :  { %s1589_s3 = scalar_lea.vmem %s56_s12, 16  ;;  %s1593_s20 = scalar_lea.vmem %s56_s12, 32 }
  0x3e   :  { %p1590_p13 = scmp.ne.s32.totalorder %s56_s12, %s1589_s3  ;;  %p1594_p0 = scmp.lt.s32.totalorder %s56_s12, %s56_s12 }
  0x3f   :  { %p1595_p1 = scmp.lt.s32.totalorder %s1593_s20, %s1589_s3 }
  0x41   :  { %p1596_p2 = por %p1595_p1, %p1594_p0 }
  0x43   :  { %p1597_p3 = pnand %p1596_p2, %p1590_p13 }
  0x45   :  { %1600 = shalt.err (!%p1597_p3)
}
  0x46   :  { %58 = dma.hbm_to_vmem [thread:$0]  %s2014_s6, 16, %s56_s12, [#allocation5]  }
  0x47   :  { %s1601_s7 = scalar_lea.hbm %s2016_s8, 2496 }
  0x48   :  { %p1602_p4 = scmp.ne.s32.totalorder %s2016_s8, %s1601_s7  ;;  %p1605_p5 = scmp.lt.u32.totalorder %s1601_s7, %s2016_s8 }
  0x4a   :  { %p1607_p6 = pnand %p1605_p5, %p1602_p4 }
  0x4c   :  { %1610 = shalt.err (!%p1607_p6)
}
  0x4d   :  { %s1611_s13 = scalar_lea.vmem %s77_s15, 2496  ;;  %p1616_p8 = scmp.lt.s32.totalorder %s77_s15, %s77_s15 }
  0x4e   :  { %p1612_p7 = scmp.ne.s32.totalorder %s77_s15, %s1611_s13  ;;  %p1617_p9 = scmp.lt.s32.totalorder %s1611_s13, %s1611_s13 }
  0x50   :  { %p1618_p10 = por %p1617_p9, %p1616_p8 }
  0x52   :  { %p1619_p11 = pnand %p1618_p10, %p1612_p7 }
  0x54   :  { %1622 = shalt.err (!%p1619_p11)
}
  0x55   :  { %82 = dma.hbm_to_vmem [thread:$0]  %s2016_s8, 2496, %s77_s15, [#allocation8], %s1655_s4, %s1655_s4, %s1656_s14  }
  0x56   :  { %s1662_s17 = smov [#allocation10]   ;;  %s1623_s22 = scalar_lea.hbm %s2017_s9, 48 }
  0x57   :  { %s89_s18 = sshll.u32 %s1662_s17, 4  ;;  %p1624_p12 = scmp.ne.s32.totalorder %s2017_s9, %s1623_s22  ;;  %s90_s18 = int_to_ptr.vmem [resolvable:$true] %s89_s18 }
  0x58   :  { %p1627_p13 = scmp.lt.u32.totalorder %s1623_s22, %s2017_s9 }
  0x5a   :  { %p1629_p0 = pnand %p1627_p13, %p1624_p12 }
  0x5c   :  { %1632 = shalt.err (!%p1629_p0)
}
  0x5d   :  { %s1633_s25 = scalar_lea.vmem %s90_s18, 48  ;;  %s1637_s8 = scalar_lea.vmem %s90_s18, 64 }
  0x5e   :  { %p1634_p1 = scmp.ne.s32.totalorder %s90_s18, %s1633_s25  ;;  %p1638_p2 = scmp.lt.s32.totalorder %s90_s18, %s90_s18 }
  0x5f   :  { %p1639_p3 = scmp.lt.s32.totalorder %s1637_s8, %s1633_s25 }
  0x61   :  { %p1640_p4 = por %p1639_p3, %p1638_p2 }
  0x63   :  { %p1641_p5 = pnand %p1640_p4, %p1634_p1 }
  0x65   :  { %1644 = shalt.err (!%p1641_p5)
}
  0x66   :  { %92 = dma.hbm_to_vmem [thread:$0]  %s2017_s9, 48, %s90_s18, [#allocation11]  }
  0x67   :  { %1645 = dma.done.wait [#allocation3], 1024  }
  0x68   :  { %1646 = vsyncadd [#allocation3], 4294966272 }
  0x69   :  { %1647 = dma.done.wait [#allocation5], 48  }
  0x6a   :  { %1648 = vsyncadd [#allocation5], 4294967248 }
  0x6b   :  { %1649 = dma.done.wait [#allocation8], 5952  }
  0x6c   :  { %1650 = vsyncadd [#allocation8], 4294961344 }
  0x6d   :  { %1651 = dma.done.wait [#allocation11], 48  }
  0x6e   :  { %1652 = vsyncadd [#allocation11], 4294967248  ;;  %v1663_v0 = vmov 0   ;;  %v1414_v1 = vld [vmem:[#allocation2 + $0x4] ss:$8 sps:$4 sm:$0xff]   ;;  %vm175_vm0 = vcmask 1045504   ;;  %v123_v38 = vlaneseq }
  0x6f   :  { %214 = vmatprep.mubr.bf16.mxu0 %v1663_v0  ;;  %v1416_v2 = vld [vmem:[#allocation2] ss:$8 sps:$4 sm:$0xff]   ;;  %182 = vmatprep.subr.bf16.mxu0 %v1414_v1  ;;  %v1417_v3 = vld [vmem:[#allocation2 + $0x14] ss:$8 sps:$4 sm:$0xff]   ;;  %v1419_v4 = vld [vmem:[#allocation2 + $0x10] ss:$8 sps:$4 sm:$0xff]  }
  0x70   :  { %183 = vmatpush1.bf16.msra.mxu0 %v1416_v2  ;;  %v1420_v5 = vld [vmem:[#allocation2 + $0x24] ss:$8 sps:$4 sm:$0xff]   ;;  %v1422_v6 = vld [vmem:[#allocation2 + $0x20] ss:$8 sps:$4 sm:$0xff]   ;;  %v1430_v13 = vld [vmem:[%s2013_s5 + $0x50] sm:$0xff]   ;;  %vm171_vm1 = vcmask 490496  }
  0x71   :  { %184 = vmatprep.subr.bf16.mxu0 %v1417_v3  ;;  %v1426_v7 = vld [vmem:[%s2013_s5 + $0x40] sm:$0xff]   ;;  %v1423_v8 = vld [vmem:[#allocation2 + $0x34] ss:$8 sps:$4 sm:$0x3f]   ;;  %v1428_v11 = vld [vmem:[%s2013_s5 + $0x48] sm:$0xff]   ;;  %v1664_v29 = vmov 0.0  }
  0x72   :  { %v1425_v9 = vld [vmem:[#allocation2 + $0x30] ss:$8 sps:$4 sm:$0x3f]   ;;  %1330 = vmatprep.subr.bf16.mxu1 %v1426_v7  ;;  %v1427_v10 = vld [vmem:[%s2013_s5] sm:$0xff]   ;;  %v1429_v12 = vld [vmem:[%s2013_s5 + $0x8] sm:$0xff]   ;;  %v1862_v39 = vshrl.u32 %v123_v38, 7 }
  0x73   :  { %1331 = vmatpush3.bf16.msra.mxu1 %v1427_v10  ;;  %v177_v14 = vsel %vm175_vm0, %v1425_v9, 0  ;;  %v1431_v15 = vld [vmem:[%s2013_s5 + $0x10] sm:$0xff]   ;;  %v1432_v16 = vld [vmem:[%s2013_s5 + $0x58] sm:$0xff]   ;;  %v112_v17 = vld [vmem:[%s2009_s1] sm:$0x1]  ;;  %vm555_vm2 = vcmask 1041408  }
  0x74   :  { %185 = vmatpush1.bf16.msra.mxu0 %v1419_v4  ;;  %1332 = vmatprep.subr.bf16.mxu1 %v1428_v11  ;;  %v1433_v18 = vld [vmem:[%s2013_s5 + $0x18] sm:$0xff]   ;;  %v1434_v19 = vld [vmem:[%s2013_s5 + $0x60] sm:$0xff]   ;;  %v1436_v21 = vld [vmem:[%s2013_s5 + $0x68] sm:$0xff]   ;;  %v125_v40 = vsub.s32 0, %v1862_v39  ;;  %v129_v42 = vsub.s32 1, %v1862_v39  ;;  %vm1665_vm3 = vmmov 0  }
  0x75   :  { %186 = vmatprep.subr.bf16.mxu0 %v1420_v5  ;;  %v1435_v20 = vld [vmem:[%s2013_s5 + $0x20] sm:$0xff]   ;;  %v1437_v22 = vld [vmem:[%s2013_s5 + $0x28] sm:$0xff]   ;;  %v1438_v23 = vld [vmem:[%s2013_s5 + $0x70] sm:$0xff]   ;;  %vm551_vm4 = vcmask 818176   ;;  %vm651_vm5 = vcmask 15360   ;;  %vm1067_vm6 = vcmask 97280  }
  0x76   :  { %v1439_v24 = vld [vmem:[%s2013_s5 + $0x30] sm:$0xff]   ;;  %v1440_v25 = vld [vmem:[%s2013_s5 + $0x78] sm:$0xff]   ;;  %v1444_v28 = vld [vmem:[#allocation9 + $0x4] ss:$12 sps:$4 sm:$0xff]  }
  0x77   :  { %1333 = vmatpush3.bf16.msra.mxu1 %v1429_v12  ;;  %v1441_v26 = vld [vmem:[%s2013_s5 + $0x38] sm:$0xff]   ;;  %v1446_v31 = vld [vmem:[#allocation9 + $0x18] ss:$12 sps:$4 sm:$0xff]   ;;  %v1454_v35 = vld [vmem:[#allocation9 + $0x48] ss:$12 sps:$4 sm:$0xff]  }
  0x78   :  { %187 = vmatpush1.bf16.msra.mxu0 %v1422_v6  ;;  %1334 = vmatprep.subr.bf16.mxu1 %v1430_v13  ;;  %v1442_v27 = vld [vmem:[#allocation9] ss:$12 sps:$4 sm:$0xff]   ;;  %v1448_v30 = vld [vmem:[#allocation9 + $0x1c] ss:$12 sps:$4 sm:$0xff]   ;;  %v1460_v36 = vld [vmem:[#allocation9 + $0x64] ss:$12 sps:$4 sm:$0xff]  }
  0x79   :  { %1234 = vmatprep.subr.msk.bf16.mxu0 %vm175_vm0, %v1423_v8  ;;  %v1452_v32 = vld [vmem:[#allocation9 + $0x34] ss:$12 sps:$4 sm:$0xff]   ;;  %v1450_v33 = vld [vmem:[#allocation9 + $0x30] ss:$12 sps:$4 sm:$0xff]   ;;  %v1456_v34 = vld [vmem:[#allocation9 + $0x4c] ss:$12 sps:$4 sm:$0xff]  }
  0x7a   :  { %v1458_v37 = vld [vmem:[#allocation9 + $0x60] ss:$12 sps:$4 sm:$0xff]   ;;  %v121_v41 = vld [vmem:[#allocation4] sm:$0x3]  ;;  %v1445_v54 = vld [vmem:[#allocation9 + $0x8] ss:$12 sps:$4 sm:$0xff]  }
  0x7b   :  { %1335 = vmatpush3.bf16.msra.mxu1 %v1431_v15  ;;  %v126_v43 = vrot.slane %v121_v41, %v125_v40  ;;  %v130_v44 = vrot.slane %v121_v41, %v129_v42  ;;  %v1449_v56 = vld [vmem:[#allocation9 + $0x20] ss:$12 sps:$4 sm:$0xff]   ;;  %v1453_v57 = vld [vmem:[#allocation9 + $0x38] ss:$12 sps:$4 sm:$0xff]   ;;  %v1457_v58 = vld [vmem:[#allocation9 + $0x50] ss:$12 sps:$4 sm:$0xff]  }
  0x7c   :  { %189 = vmatpush1.bf16.msra.mxu0 %v177_v14  ;;  %1336 = vmatprep.subr.bf16.mxu1 %v1432_v16  ;;  %v1461_v59 = vld [vmem:[#allocation9 + $0x68] ss:$12 sps:$4 sm:$0xff]   ;;  %v1462_v61 = vld [vmem:[#allocation9 + $0x78] ss:$12 sps:$4 sm:$0xff]   ;;  %v1465_v62 = vld [vmem:[#allocation9 + $0x80] ss:$12 sps:$4 sm:$0xff]  }
  0x7d   :  { %565 = vmatprep.subr.bf16.mxu0 %v1444_v28  ;;  %v1464_v60 = vld [vmem:[#allocation9 + $0x7c] ss:$12 sps:$4 sm:$0xff]   ;;  %v428_v63 = vld [vmem:[#allocation9 + $0x90] sm:$0x33]  ;;  %v1236_v7 = vld [vmem:[#allocation6] ss:$0 sm:$0xff] }
  0x7e   :  { %v1272_v1 = vcombine.high %v428_v63, %v428_v63  ;;  %v1271_v2 = vcombine.low %v428_v63, %v428_v63  ;;  %v1468_v3 = vld [vmem:[#allocation9 + $0x98] ss:$0 sps:$4 sm:$0x33]   ;;  %v442_v15 = vsub.s32 2, %v1862_v39  ;;  %v430_v16 = vld [vmem:[#allocation10] sm:$0x7] }
  0x7f   :  { %1235 = vmatmul.mubr.msk.bf16.vlgmr.msra.gmra.mrb[0].mxu0 %vm171_vm1, %v112_v17  ;;  %1337 = vmatpush3.bf16.msra.mxu1 %v1433_v18  ;;  %v563_v5 = vsel %vm555_vm2, %v1468_v3, 0  ;;  %v439_v18 = vrot.slane %v430_v16, %v129_v42  ;;  %v647_v38 = vld [vmem:[%s2010_s2 + $0x8] sm:$0xff]  ;;  %v648_v42 = vld [vmem:[%s2010_s2 + $0x10] sm:$0xff] }
  0x80   :  { %597 = vmatprep.mubr.bf16.mxu0 %v1663_v0  ;;  %1338 = vmatprep.subr.bf16.mxu1 %v1434_v19  ;;  %v557_v4 = vsel %vm555_vm2, %v1271_v2, 0  ;;  %v443_v17 = vrot.slane %v430_v16, %v442_v15  ;;  %v435_v19 = vrot.slane %v430_v16, %v125_v40  ;;  %v1474_v39 = vld [vmem:[#allocation7 + $0x18] ss:$12 sps:$4 sm:$0xff]   ;;  %v1480_v40 = vld [vmem:[#allocation7 + $0x34] ss:$12 sps:$4 sm:$0xff]  }
  0x81   :  { %566 = vmatpush1.bf16.msra.mxu0 %v1442_v27  ;;  %v1477_v41 = vld [vmem:[#allocation7 + $0x38] ss:$12 sps:$4 sm:$0xff]   ;;  %v1504_v63 = vld [vmem:[#allocation7 + $0xc0] ss:$12 sps:$4 sm:$0x3f]  }
  0x82   :  { %567 = vmatprep.subr.bf16.mxu0 %v1448_v30  ;;  %v646_v30 = vld [vmem:[%s2010_s2] sm:$0xff]  ;;  %v1078_v2 = vsel %vm175_vm0, %v1504_v63, 0 }
  0x83   :  { %1339 = vmatpush3.bf16.msra.mxu1 %v1435_v20  ;;  %v1505_v3 = vld [vmem:[%s2008_s0] ss:$8 sps:$4 sm:$0xff]  }
  0x84   :  { %1340 = vmatprep.subr.bf16.mxu1 %v1436_v21 }
  0x85   :  { %568 = vmatpush1.bf16.msra.mxu0 %v1446_v31  ;;  %v1472_v31 = vld [vmem:[#allocation7 + $0x4] ss:$12 sps:$4 sm:$0xff]  }
  0x86   :  { %569 = vmatprep.subr.bf16.mxu0 %v1452_v32 }
  0x87   :  { %1341 = vmatpush3.bf16.msra.mxu1 %v1437_v22 }
  0x88   :  { %1342 = vmatprep.subr.bf16.mxu1 %v1438_v23 }
  0x89   :  { %570 = vmatpush1.bf16.msra.mxu0 %v1450_v33 }
  0x8a   :  { %571 = vmatprep.subr.bf16.mxu0 %v1456_v34 }
  0x8b   :  { %1343 = vmatpush3.bf16.msra.mxu1 %v1439_v24 }
  0x8c   :  { %1344 = vmatprep.subr.bf16.mxu1 %v1440_v25  ;;  %v1469_v25 = vld [vmem:[#allocation7 + $0x8] ss:$12 sps:$4 sm:$0xff]  }
  0x8d   :  { %572 = vmatpush1.bf16.msra.mxu0 %v1454_v35  ;;  %v1470_v35 = vld [vmem:[#allocation7] ss:$12 sps:$4 sm:$0xff]  }
  0x8e   :  { %573 = vmatprep.subr.bf16.mxu0 %v1460_v36  ;;  %v1476_v36 = vld [vmem:[#allocation7 + $0x1c] ss:$12 sps:$4 sm:$0xff]  }
  0x8f   :  { %1345 = vmatpush3.bf16.msra.mxu1 %v1441_v26 }
  0x90   :  { %1366 = vmatprep.subr.bf16.mxu1 %v1664_v29 }
  0x91   :  { %574 = vmatpush1.bf16.msra.mxu0 %v1458_v37  ;;  %v1473_v37 = vld [vmem:[#allocation7 + $0x20] ss:$12 sps:$4 sm:$0xff]  }
  0x92   :  { %575 = vmatprep.subr.bf16.mxu0 %v1464_v60  ;;  %v1501_v60 = vld [vmem:[#allocation7 + $0xc8] ss:$12 sps:$4 sm:$0x3f]  }
  0x95   :  { %576 = vmatpush1.bf16.msra.mxu0 %v1462_v61  ;;  %v1498_v61 = vld [vmem:[#allocation7 + $0xa8] ss:$12 sps:$4 sm:$0xff]  }
  0x96   :  { %1274 = vmatprep.subr.msk.bf16.mxu0 %vm555_vm2, %v1272_v1  ;;  %v1084_v1 = vsel %vm175_vm0, %v1501_v60, 0 }
  0x99   :  { %578 = vmatpush1.bf16.msra.mxu0 %v557_v4  ;;  %v1508_v4 = vld [vmem:[%s2008_s0 + $0x14] ss:$8 sps:$4 sm:$0xff]  }
 0x152   :  { %v216_v45 = vpop.f32.mrb[0].mxu0 }
 0x153   :  { %v217_v46 = vadd.f32 %v216_v45, %v126_v43  ;;  %v218_v47 = vpop.f32.mrb[1].mxu0  ;;  %v1478_v43 = vld [vmem:[#allocation7 + $0x30] ss:$12 sps:$4 sm:$0xff]  }
 0x154   :  { %v219_v48 = vadd.f32 %v218_v47, %v130_v44  ;;  %v220_v49 = vpop.f32.mrb[2].mxu0  ;;  %v1484_v44 = vld [vmem:[#allocation7 + $0x4c] ss:$12 sps:$4 sm:$0xff]   ;;  %v1481_v45 = vld [vmem:[#allocation7 + $0x50] ss:$12 sps:$4 sm:$0xff]  }
 0x155   :  { %v223_v50 = vmax.f32 %v217_v46, 0.0  ;;  %v221_v51 = vpop.f32.mrb[3].mxu0  ;;  %v649_v46 = vld [vmem:[%s2010_s2 + $0x18] sm:$0xff] }
 0x156   :  { %v224_v52 = vmax.f32 %v219_v48, 0.0  ;;  %v1482_v47 = vld [vmem:[#allocation7 + $0x48] ss:$12 sps:$4 sm:$0xff]   ;;  %v1488_v48 = vld [vmem:[#allocation7 + $0x64] ss:$12 sps:$4 sm:$0xff]  }
 0x157   :  { %v225_v55 = vpack.c.bf16 %v223_v50, %v223_v50  ;;  %v1485_v49 = vld [vmem:[#allocation7 + $0x68] ss:$12 sps:$4 sm:$0xff]   ;;  %v650_v50 = vld [vmem:[%s2010_s2 + $0x20] sm:$0xff] }
 0x158   :  { %v226_v53 = vpack.c.bf16 %v224_v52, %v224_v52  ;;  %v1486_v51 = vld [vmem:[#allocation7 + $0x60] ss:$12 sps:$4 sm:$0xff]  }
 0x159   :  { %v1507_v52 = vld [vmem:[%s2008_s0 + $0x4] ss:$8 sps:$4 sm:$0xff]  }
 0x15a   :  { %394 = vmatprep.mubr.bf16.mxu1 %v226_v53  ;;  %v1492_v53 = vld [vmem:[#allocation7 + $0x7c] ss:$12 sps:$4 sm:$0xff]  }
 0x15b   :  { %395 = vmatmul.mubr.bf16.vlgmr.msra.gmra.mrb[0].mxu1 %v225_v55  ;;  %v1490_v55 = vld [vmem:[#allocation7 + $0x78] ss:$12 sps:$4 sm:$0xff]  }
 0x15c   :  { %1367 = vmatpush3.bf16.msra.mxu1 %v1445_v54  ;;  %1380 = vmatprep.mubr.msk.bf16.mxu1 %vm1665_vm3, %v1664_v29  ;;  %v1489_v54 = vld [vmem:[#allocation7 + $0x80] ss:$12 sps:$4 sm:$0xff]  }
 0x15d   :  { %1368 = vmatprep.subr.bf16.mxu1 %v1664_v29 }
 0x160   :  { %1369 = vmatpush3.bf16.msra.mxu1 %v1449_v56  ;;  %v1496_v56 = vld [vmem:[#allocation7 + $0x94] ss:$12 sps:$4 sm:$0xff]  }
 0x161   :  { %1370 = vmatprep.subr.bf16.mxu1 %v1664_v29 }
 0x164   :  { %1371 = vmatpush3.bf16.msra.mxu1 %v1453_v57  ;;  %v1493_v57 = vld [vmem:[#allocation7 + $0x98] ss:$12 sps:$4 sm:$0xff]  }
 0x165   :  { %1372 = vmatprep.subr.bf16.mxu1 %v1664_v29 }
 0x168   :  { %1373 = vmatpush3.bf16.msra.mxu1 %v1457_v58  ;;  %v1494_v58 = vld [vmem:[#allocation7 + $0x90] ss:$12 sps:$4 sm:$0xff]  }
 0x169   :  { %1374 = vmatprep.subr.bf16.mxu1 %v1664_v29 }
 0x16c   :  { %1375 = vmatpush3.bf16.msra.mxu1 %v1461_v59  ;;  %v1497_v59 = vld [vmem:[#allocation7 + $0xb0] ss:$12 sps:$4 sm:$0xff]  }
 0x16d   :  { %1376 = vmatprep.subr.bf16.mxu1 %v1664_v29 }
 0x170   :  { %1377 = vmatpush3.bf16.msra.mxu1 %v1465_v62  ;;  %v1502_v62 = vld [vmem:[#allocation7 + $0xc4] ss:$12 sps:$4 sm:$0x3f]  }
 0x171   :  { %1378 = vmatprep.subr.bf16.mxu1 %v1664_v29 }
 0x174   :  { %1379 = vmatpush3.bf16.msra.mxu1 %v563_v5  ;;  %v1510_v5 = vld [vmem:[%s2008_s0 + $0x10] ss:$8 sps:$4 sm:$0xff]  }
 0x175   :  { %1384 = vmatprep.subr.mxu1 %v1664_v29 }
 0x22e   :  { %v1346_v6 = vpop.f32.mrb[0].mxu1 }
 0x22f   :  { %v1347_v8 = vpop.f32.mrb[1].mxu1 }
 0x230   :  { %v1348_v9 = vadd.f32 %v1347_v8, %v1346_v6  ;;  %v1349_v10 = vpop.f32.mrb[2].mxu1 }
 0x231   :  { %v1350_v11 = vpop.f32.mrb[3].mxu1 }
 0x232   :  { %v397_v12 = vadd.f32 %v1348_v9, %v1236_v7 }
 0x234   :  { %v402_v13 = vmax.f32 %v397_v12, 0.0 }
 0x236   :  { %v403_v14 = vpack.c.bf16 %v402_v13, %v402_v13 }
 0x238   :  { %1275 = vmatmul.mubr.msk.bf16.vlgmr.msra.gmra.mrb[4].mxu0 %vm551_vm4, %v403_v14  ;;  %1381 = vmatmul.mubr.msk.bf16.vlgmr.msra.gmra.mrb[4].mxu1 %vm551_vm4, %v403_v14 }
 0x239   :  { %1386 = vmatprep.mubr.msk.f32.mxu1 %vm1665_vm3, %v1664_v29  ;;  %740 = vmatprep.mubr.f32.mxu0 %v1664_v29 }
 0x30b   :  { %v599_v20 = vpop.f32.mrb[4].mxu0  ;;  %v640_v21 = vpop.f32.mrb[4].mxu1 }
 0x30c   :  { %v641_v22 = vadd.f32 %v640_v21, %v443_v17  ;;  %v601_v23 = vpop.f32.mrb[5].mxu0  ;;  %v1382_v24 = vpop.f32.mrb[5].mxu1  ;;  %v600_v32 = vadd.f32 %v599_v20, %v435_v19 }
 0x30d   :  { %v602_v26 = vadd.f32 %v601_v23, %v439_v18  ;;  %v603_v27 = vpop.f32.mrb[6].mxu0  ;;  %v643_v28 = vpop.f32.mrb[6].mxu1 }
 0x30e   :  { %v604_v33 = vpop.f32.mrb[7].mxu0  ;;  %v1383_v34 = vpop.f32.mrb[7].mxu1  ;;  %1385 = vmatpush3.msk.msra.mxu1 %vm555_vm2, %v641_v22 }
 0x30f   :  { %1277 = vmatprep.subr.msk.mxu0 %vm555_vm2, %v602_v26  ;;  %1147 = vmatprep.subr.bf16.mxu1 %v1663_v0 }
 0x310   :  { %1278 = vmatpush1.msk.msra.mxu0 %vm555_vm2, %v600_v32  ;;  %1387 = vmatmul.mubr.msk.f32.vlgmr.msra.gmra.mrb[8].mxu1 %vm651_vm5, %v646_v30 }
 0x311   :  { %1148 = vmatpush1.bf16.msra.mxu1 %v1469_v25  ;;  %1086 = vmatprep.subr.bf16.mxu0 %v1472_v31 }
 0x312   :  { %1279 = vmatmul.mubr.msk.f32.vlgmr.msra.gmra.mrb[8].mxu0 %vm651_vm5, %v646_v30  ;;  %1149 = vmatprep.subr.bf16.mxu1 %v1663_v0 }
 0x313   :  { %1087 = vmatpush1.bf16.msra.mxu0 %v1470_v35  ;;  %1389 = vmatprep.mubr.msk.f32.mxu1 %vm1665_vm3, %v1664_v29 }
 0x314   :  { %1088 = vmatprep.subr.bf16.mxu0 %v1476_v36  ;;  %1390 = vmatmul.mubr.msk.f32.gmra.mrb[10].mxu1 %vm651_vm5, %v647_v38 }
 0x315   :  { %1150 = vmatpush1.bf16.msra.mxu1 %v1473_v37  ;;  %746 = vmatprep.mubr.f32.mxu0 %v1664_v29 }
 0x316   :  { %1151 = vmatprep.subr.bf16.mxu1 %v1663_v0  ;;  %1280 = vmatmul.mubr.msk.f32.gmra.mrb[10].mxu0 %vm651_vm5, %v647_v38 }
 0x317   :  { %1089 = vmatpush1.bf16.msra.mxu0 %v1474_v39  ;;  %1392 = vmatprep.mubr.msk.f32.mxu1 %vm1665_vm3, %v1664_v29 }
 0x318   :  { %1090 = vmatprep.subr.bf16.mxu0 %v1480_v40  ;;  %1393 = vmatmul.mubr.msk.f32.gmra.mrb[12].mxu1 %vm651_vm5, %v648_v42 }
 0x319   :  { %1152 = vmatpush1.bf16.msra.mxu1 %v1477_v41  ;;  %752 = vmatprep.mubr.f32.mxu0 %v1664_v29 }
 0x31a   :  { %1153 = vmatprep.subr.bf16.mxu1 %v1663_v0  ;;  %1281 = vmatmul.mubr.msk.f32.gmra.mrb[12].mxu0 %vm651_vm5, %v648_v42 }
 0x31b   :  { %1091 = vmatpush1.bf16.msra.mxu0 %v1478_v43  ;;  %1395 = vmatprep.mubr.msk.f32.mxu1 %vm1665_vm3, %v1664_v29 }
 0x31c   :  { %1092 = vmatprep.subr.bf16.mxu0 %v1484_v44  ;;  %1396 = vmatmul.mubr.msk.f32.gmra.mrb[14].mxu1 %vm651_vm5, %v649_v46 }
 0x31d   :  { %1154 = vmatpush1.bf16.msra.mxu1 %v1481_v45  ;;  %758 = vmatprep.mubr.f32.mxu0 %v1664_v29 }
 0x31e   :  { %1155 = vmatprep.subr.bf16.mxu1 %v1663_v0  ;;  %1282 = vmatmul.mubr.msk.f32.gmra.mrb[14].mxu0 %vm651_vm5, %v649_v46 }
 0x31f   :  { %1093 = vmatpush1.bf16.msra.mxu0 %v1482_v47  ;;  %1398 = vmatprep.mubr.msk.f32.mxu1 %vm1665_vm3, %v1664_v29 }
 0x320   :  { %1094 = vmatprep.subr.bf16.mxu0 %v1488_v48  ;;  %1399 = vmatmul.mubr.msk.f32.gmra.mrb[16].mxu1 %vm651_vm5, %v650_v50 }
 0x321   :  { %1156 = vmatpush1.bf16.msra.mxu1 %v1485_v49  ;;  %764 = vmatprep.mubr.f32.mxu0 %v1664_v29  ;;  %v1500_v29 = vld [vmem:[#allocation7 + $0xac] ss:$12 sps:$4 sm:$0xff]  }
 0x322   :  { %1157 = vmatprep.subr.bf16.mxu1 %v1663_v0  ;;  %1283 = vmatmul.mubr.msk.f32.gmra.mrb[16].mxu0 %vm651_vm5, %v650_v50 }
 0x323   :  { %1095 = vmatpush1.bf16.msra.mxu0 %v1486_v51  ;;  %1327 = vmatprep.mubr.msk.bf16.mxu1 %vm1067_vm6, %v1507_v52 }
 0x324   :  { %1096 = vmatprep.subr.bf16.mxu0 %v1492_v53  ;;  %1324 = vmatprep.mubr.msk.bf16.mxu0 %vm1067_vm6, %v1507_v52 }
 0x325   :  { %1158 = vmatpush1.bf16.msra.mxu1 %v1489_v54 }
 0x326   :  { %1159 = vmatprep.subr.bf16.mxu1 %v1663_v0 }
 0x327   :  { %1097 = vmatpush1.bf16.msra.mxu0 %v1490_v55 }
 0x328   :  { %1098 = vmatprep.subr.bf16.mxu0 %v1496_v56 }
 0x329   :  { %1160 = vmatpush1.bf16.msra.mxu1 %v1493_v57 }
 0x32a   :  { %1161 = vmatprep.subr.bf16.mxu1 %v1663_v0 }
 0x32b   :  { %1099 = vmatpush1.bf16.msra.mxu0 %v1494_v58 }
 0x32c   :  { %1100 = vmatprep.subr.bf16.mxu0 %v1500_v29 }
 0x32d   :  { %1162 = vmatpush1.bf16.msra.mxu1 %v1497_v59 }
 0x32e   :  { %1163 = vmatprep.subr.bf16.mxu1 %v1663_v0  ;;  %v865_v0 = vld [vmem:[%s2008_s0 + $0x20] sm:$0xff] }
 0x32f   :  { %1101 = vmatpush1.bf16.msra.mxu0 %v1498_v61  ;;  %v1295_v6 = vcombine.high %v865_v0, %v865_v0  ;;  %v1294_v7 = vcombine.low %v865_v0, %v865_v0 }
 0x330   :  { %1323 = vmatprep.subr.msk.bf16.mxu0 %vm175_vm0, %v1502_v62 }
 0x331   :  { %1164 = vmatpush1.bf16.msra.mxu1 %v1084_v1 }
 0x333   :  { %1103 = vmatpush1.bf16.msra.mxu0 %v1078_v2 }
 0x334   :  { %1180 = vmatmul.mubr.bf16.vlgmr.msra.gmra.mrb[20].mxu1 %v1505_v3 }
 0x335   :  { %1328 = vmatprep.mubr.msk.bf16.mxu1 %vm1067_vm6, %v1508_v4 }
 0x336   :  { %1119 = vmatmul.mubr.bf16.vlgmr.msra.gmra.mrb[20].mxu0 %v1505_v3 }
 0x337   :  { %1325 = vmatprep.mubr.msk.bf16.mxu0 %vm1067_vm6, %v1508_v4 }
 0x33c   :  { %1188 = vmatmul.mubr.bf16.gmra.mrb[24].mxu1 %v1510_v5 }
 0x33d   :  { %1329 = vmatprep.mubr.msk.bf16.mxu1 %vm1067_vm6, %v1295_v6 }
 0x33e   :  { %1129 = vmatmul.mubr.bf16.gmra.mrb[24].mxu0 %v1510_v5 }
 0x33f   :  { %1326 = vmatprep.mubr.msk.bf16.mxu0 %vm1067_vm6, %v1295_v6 }
 0x344   :  { %1196 = vmatmul.mubr.bf16.gmra.mrb[28].mxu1 %v1294_v7 }
 0x346   :  { %1139 = vmatmul.mubr.bf16.gmra.mrb[28].mxu0 %v1294_v7 }
 0x3e3   :  { %v837_v8 = vpop.f32.mrb[8].mxu1 }
 0x3e4   :  { %v1388_v9 = vpop.f32.mrb[9].mxu1 }
 0x3e5   :  { %v742_v10 = vpop.f32.mrb[8].mxu0 }
 0x3e6   :  { %v744_v11 = vpop.f32.mrb[9].mxu0 }
 0x3e7   :  { %v842_v12 = vpop.f32.mrb[10].mxu1 }
 0x3e8   :  { %v1391_v13 = vpop.f32.mrb[11].mxu1 }
 0x3e9   :  { %v748_v14 = vpop.f32.mrb[10].mxu0 }
 0x3ea   :  { %v750_v15 = vpop.f32.mrb[11].mxu0 }
 0x3eb   :  { %v847_v16 = vpop.f32.mrb[12].mxu1 }
 0x3ec   :  { %v1394_v17 = vpop.f32.mrb[13].mxu1 }
 0x3ed   :  { %v754_v18 = vpop.f32.mrb[12].mxu0 }
 0x3ee   :  { %v756_v19 = vpop.f32.mrb[13].mxu0 }
 0x3ef   :  { %v852_v20 = vpop.f32.mrb[14].mxu1 }
 0x3f0   :  { %v1397_v21 = vpop.f32.mrb[15].mxu1 }
 0x3f1   :  { %v760_v22 = vpop.f32.mrb[14].mxu0 }
 0x3f2   :  { %v762_v23 = vpop.f32.mrb[15].mxu0 }
 0x3f3   :  { %v857_v24 = vpop.f32.mrb[16].mxu1 }
 0x3f4   :  { %v1400_v25 = vpop.f32.mrb[17].mxu1 }
 0x3f5   :  { %v766_v26 = vpop.f32.mrb[16].mxu0 }
 0x3f6   :  { %v768_v27 = vpop.f32.mrb[17].mxu0 }
 0x407   :  { %v1181_v28 = vpop.f32.mrb[20].mxu1 }
 0x408   :  { %v1182_v30 = vadd.f32 %v1181_v28, %v837_v8  ;;  %v1183_v31 = vpop.f32.mrb[21].mxu1 }
 0x409   :  { %v1120_v32 = vpop.f32.mrb[20].mxu0  ;;  %v1184_v33 = vpop.f32.mrb[22].mxu1 }
 0x40a   :  { %1205 = vst [vmem:[%s2018_s10 + $0x10] sm:$0xff] %v1182_v30  ;;  %v1121_v34 = vadd.f32 %v1120_v32, %v742_v10  ;;  %v1185_v35 = vadd.f32 %v1184_v33, %v842_v12  ;;  %v1122_v36 = vpop.f32.mrb[21].mxu0  ;;  %v1186_v37 = vpop.f32.mrb[23].mxu1 }
 0x40b   :  { %v1123_v38 = vadd.f32 %v1122_v36, %v744_v11  ;;  %v1124_v39 = vpop.f32.mrb[22].mxu0 }
 0x40c   :  { %1203 = vst [vmem:[%s2018_s10] sm:$0xff] %v1121_v34  ;;  %1208 = vst [vmem:[%s2018_s10 + $0x28] sm:$0xff] %v1185_v35  ;;  %v1125_v40 = vadd.f32 %v1124_v39, %v748_v14  ;;  %v1126_v41 = vpop.f32.mrb[23].mxu0 }
 0x40d   :  { %1204 = vst [vmem:[%s2018_s10 + $0x8] sm:$0xff] %v1123_v38  ;;  %v1127_v42 = vadd.f32 %v1126_v41, %v750_v15 }
 0x40e   :  { %1206 = vst [vmem:[%s2018_s10 + $0x18] sm:$0xff] %v1125_v40 }
 0x40f   :  { %1207 = vst [vmem:[%s2018_s10 + $0x20] sm:$0xff] %v1127_v42  ;;  %v1189_v43 = vpop.f32.mrb[24].mxu1 }
 0x410   :  { %v1190_v44 = vadd.f32 %v1189_v43, %v847_v16  ;;  %v1191_v45 = vpop.f32.mrb[25].mxu1 }
 0x411   :  { %v1130_v46 = vpop.f32.mrb[24].mxu0  ;;  %v1192_v47 = vpop.f32.mrb[26].mxu1 }
 0x412   :  { %1211 = vst [vmem:[%s2018_s10 + $0x40] sm:$0xff] %v1190_v44  ;;  %v1131_v48 = vadd.f32 %v1130_v46, %v754_v18  ;;  %v1193_v49 = vadd.f32 %v1192_v47, %v852_v20  ;;  %v1132_v50 = vpop.f32.mrb[25].mxu0  ;;  %v1194_v51 = vpop.f32.mrb[27].mxu1 }
 0x413   :  { %v1133_v52 = vadd.f32 %v1132_v50, %v756_v19  ;;  %v1134_v53 = vpop.f32.mrb[26].mxu0 }
 0x414   :  { %1209 = vst [vmem:[%s2018_s10 + $0x30] sm:$0xff] %v1131_v48  ;;  %1214 = vst [vmem:[%s2018_s10 + $0x58] sm:$0xff] %v1193_v49  ;;  %v1135_v54 = vadd.f32 %v1134_v53, %v760_v22  ;;  %v1136_v55 = vpop.f32.mrb[27].mxu0 }
 0x415   :  { %1210 = vst [vmem:[%s2018_s10 + $0x38] sm:$0xff] %v1133_v52  ;;  %v1137_v56 = vadd.f32 %v1136_v55, %v762_v23 }
 0x416   :  { %1212 = vst [vmem:[%s2018_s10 + $0x48] sm:$0xff] %v1135_v54 }
 0x417   :  { %1213 = vst [vmem:[%s2018_s10 + $0x50] sm:$0xff] %v1137_v56  ;;  %v1197_v57 = vpop.f32.mrb[28].mxu1 }
 0x418   :  { %v1198_v58 = vadd.f32 %v1197_v57, %v857_v24  ;;  %v1199_v29 = vpop.f32.mrb[29].mxu1 }
 0x419   :  { %v1140_v59 = vpop.f32.mrb[28].mxu0  ;;  %v1200_v60 = vpop.f32.mrb[30].mxu1 }
 0x41a   :  { %1217 = vst [vmem:[%s2018_s10 + $0x70] sm:$0xff] %v1198_v58  ;;  %v1141_v61 = vadd.f32 %v1140_v59, %v766_v26  ;;  %v1142_v62 = vpop.f32.mrb[29].mxu0  ;;  %v1201_v63 = vpop.f32.mrb[31].mxu1 }
 0x41b   :  { %v1143_v1 = vadd.f32 %v1142_v62, %v768_v27  ;;  %v1144_v2 = vpop.f32.mrb[30].mxu0 }
 0x41c   :  { %1215 = vst [vmem:[%s2018_s10 + $0x60] sm:$0xff] %v1141_v61  ;;  %v1145_v3 = vpop.f32.mrb[31].mxu0 }
 0x41d   :  { %1216 = vst [vmem:[%s2018_s10 + $0x68] sm:$0xff] %v1143_v1 }
 0x41e   :  { %1222 = vsyncpa [#allocation3], 1 }
 0x41f   :  { %1223 = vsyncpa [#allocation5], 1 }
 0x420   :  { %1224 = vsyncpa [#allocation8], 1 }
 0x421   :  { %1225 = vsyncpa [#allocation11], 1 }

</bundles_post_ra>
